<compile_context>
chip_gen: v5e
topology: v5e:2x2
jax: 0.10.0
libtpu: 0.0.40
codegen_flags: <defaults>
</compile_context>

<pallas_src>
import jax
import jax.numpy as jnp
from jax.experimental import pallas as pl
from jax.experimental.pallas import tpu as pltpu

_LANES = 128
_SUBLANES = 8
_PI = 3.14159265358979323846
_PIO2 = 1.5707963267948966


def _cdiv(a, b):
    return (a + b - 1) // b


def _round_up(a, m):
    return _cdiv(a, m) * m


def _acos_f32(x):
    """Cephes-style float32 arccos for x in [-1, 1] (abs err ~1e-7)."""
    a = jnp.abs(x)
    big = a > 0.5
    z_big = 0.5 * (1.0 - a)
    v = jnp.where(big, jnp.sqrt(z_big), a)
    z = jnp.where(big, z_big, a * a)
    p = ((((4.2163199048e-2 * z + 2.4181311049e-2) * z + 4.5470025998e-2) * z
          + 7.4953002686e-2) * z + 1.6666752422e-1)
    asin_v = v + v * z * p
    acos_abs = jnp.where(big, 2.0 * asin_v, _PIO2 - asin_v)
    return jnp.where(x < 0.0, _PI - acos_abs, acos_abs)


def _masked_angle(p_ref, t_ref):
    """Per-sample angle and validity mask, both shaped (8, tile_n)."""
    p = p_ref[...].astype(jnp.float32)                       # (3, 8, tn)
    t = t_ref[...].astype(jnp.float32)                       # (3, 8, tn)
    dot = jnp.clip(jnp.sum(p * t, axis=0), -0.9999, 0.9999)  # (8, tn)
    ang = _acos_f32(dot)
    ang = jnp.where(jnp.isnan(ang), 0.0, ang)                # nan_to_num(nan=0.0)
    mask = jnp.any(t != 0.0, axis=0)                         # (8, tn) bool
    return ang, mask


def _angular_sum_kernel(p_ref, t_ref, sum_ref, cnt_ref, acc_ref, msk_ref):
    """Accumulates masked-loss sum and valid count per shard (parallel axis 0)."""
    @pl.when(pl.program_id(1) == 0)
    def _():
        acc_ref[...] = jnp.zeros_like(acc_ref)
        msk_ref[...] = jnp.zeros_like(msk_ref)

    ang, mask = _masked_angle(p_ref, t_ref)
    acc_ref[...] += jnp.where(mask, ang, 0.0)   # (8, tn) VPU accumulation
    msk_ref[...] += jnp.where(mask, 1.0, 0.0)

    @pl.when(pl.program_id(1) == pl.num_programs(1) - 1)
    def _():
        # Single cross-lane reduce per shard, broadcast into a rule-compliant
        # (1, 8, 128) output block; the wrapper reads element [s, 0, 0].
        sum_ref[...] = jnp.full(sum_ref.shape, jnp.sum(acc_ref[...]), jnp.float32)
        cnt_ref[...] = jnp.full(cnt_ref.shape, jnp.sum(msk_ref[...]), jnp.float32)


def _angular_elem_kernel(p_ref, t_ref, o_ref):
    """Per-sample masked angular loss (reduction fall-through / 'none')."""
    ang, mask = _masked_angle(p_ref, t_ref)
    o_ref[...] = jnp.where(mask, ang, 0.0)


def _to_soa(x, n_cols):
    """(B, 3) -> (3, 8, n_cols), zero padded.  transpose+pad fuse under jit;
    the final reshape is a free row-major bitcast."""
    B = x.shape[0]
    xt = jnp.transpose(x)                                    # (3, B)
    pad = _SUBLANES * n_cols - B
    if pad:
        xt = jnp.pad(xt, ((0, 0), (0, pad)))
    return xt.reshape(3, _SUBLANES, n_cols)


def _default_num_shards():
    """1 on single-TC chips (v5e/v6e); 2 if the device advertises 2 cores."""
    try:
        return max(1, min(2, int(jax.devices()[0].num_cores)))
    except Exception:
        return 1


def spherical_angular_loss(pred, target, *, reduction="mean", eps=1e-6,
                           max_tile_n=32768, num_shards=None):
    """JAX/Pallas equivalent of SphericalAngularLoss.forward."""
    if pred.ndim != 2 or pred.shape[-1] != 3 or pred.shape != target.shape:
        raise ValueError("pred/target must both have shape (batch, 3)")
    if max_tile_n % _LANES:
        raise ValueError("max_tile_n must be a multiple of 128")
    B = pred.shape[0]

    if reduction in ("mean", "sum"):
        shards = (_default_num_shards() if num_shards is None
                  else max(1, int(num_shards)))
        per_shard = _cdiv(_cdiv(B, _SUBLANES), shards)
        tile_n = min(max_tile_n, _round_up(per_shard, _LANES))
        steps = _cdiv(per_shard, tile_n)
        n_cols = shards * steps * tile_n           # columns of 8 packed samples

        p3 = _to_soa(pred, n_cols)
        t3 = _to_soa(target, n_cols)

        sums, cnts = pl.pallas_call(
            _angular_sum_kernel,
            out_shape=(
                jax.ShapeDtypeStruct((shards, _SUBLANES, _LANES), jnp.float32),
                jax.ShapeDtypeStruct((shards, _SUBLANES, _LANES), jnp.float32)),
            grid_spec=pltpu.PrefetchScalarGridSpec(
                num_scalar_prefetch=0,
                grid=(shards, steps),
                in_specs=[
                    pl.BlockSpec((3, _SUBLANES, tile_n),
                                 lambda s, i: (0, 0, s * steps + i)),
                    pl.BlockSpec((3, _SUBLANES, tile_n),
                                 lambda s, i: (0, 0, s * steps + i)),
                ],
                out_specs=[
                    pl.BlockSpec((1, _SUBLANES, _LANES), lambda s, i: (s, 0, 0)),
                    pl.BlockSpec((1, _SUBLANES, _LANES), lambda s, i: (s, 0, 0)),
                ],
                scratch_shapes=[pltpu.VMEM((_SUBLANES, tile_n), jnp.float32),
                                pltpu.VMEM((_SUBLANES, tile_n), jnp.float32)]),
            compiler_params=pltpu.CompilerParams(
                dimension_semantics=("parallel", "arbitrary")),
        )(p3, t3)

        total = jnp.sum(sums[:, 0, 0])
        count = jnp.sum(cnts[:, 0, 0])
        if reduction == "sum":
            return total
        return total / (count + jnp.float32(eps))

    # Fall-through (matches the PyTorch module: any other reduction returns
    # the unreduced per-sample angular loss).
    per = _cdiv(B, _SUBLANES)
    tile_n = min(max_tile_n, _round_up(per, _LANES))
    steps = _cdiv(per, tile_n)
    n_cols = steps * tile_n

    p3 = _to_soa(pred, n_cols)
    t3 = _to_soa(target, n_cols)

    out = pl.pallas_call(
        _angular_elem_kernel,
        out_shape=jax.ShapeDtypeStruct((_SUBLANES, n_cols), jnp.float32),
        grid_spec=pltpu.PrefetchScalarGridSpec(
            num_scalar_prefetch=0,
            grid=(steps,),
            in_specs=[pl.BlockSpec((3, _SUBLANES, tile_n), lambda i: (0, 0, i)),
                      pl.BlockSpec((3, _SUBLANES, tile_n), lambda i: (0, 0, i))],
            out_specs=pl.BlockSpec((_SUBLANES, tile_n), lambda i: (0, i))),
        compiler_params=pltpu.CompilerParams(
            dimension_semantics=("parallel",)),
    )(p3, t3)
    # Row-major (8, n_cols) -> flat sample order: element (s, j) is sample
    # s * n_cols + j, exactly its position after reshape(-1).
    return out.reshape(-1)[:B]


def _reference(pred, target, reduction="mean", eps=1e-6):
    mask = jnp.any(target != 0, axis=1)
    dot = jnp.clip(jnp.sum(pred.astype(jnp.float32) * target.astype(jnp.float32),
                           axis=1), -0.9999, 0.9999)
    ang = jnp.arccos(dot)
    ang = jnp.where(jnp.isnan(ang), 0.0, ang) * mask.astype(jnp.float32)
    if reduction == "mean":
        return ang.sum() / (mask.sum() + eps)
    if reduction == "sum":
        return ang.sum()
    return ang


if __name__ == "__main__":
    loss_fn = jax.jit(spherical_angular_loss,
                      static_argnames=("reduction", "max_tile_n", "num_shards"))

    key = jax.random.PRNGKey(0)
    k1, k2, k3, k4 = jax.random.split(key, 4)

    # Small case: batch of 8 unit direction vectors, two rows masked out.
    B = 8
    pred = jax.random.normal(k1, (B, 3), dtype=jnp.float32)
    pred = pred / jnp.linalg.norm(pred, axis=1, keepdims=True)
    target = jax.random.normal(k2, (B, 3), dtype=jnp.float32)
    target = target / jnp.linalg.norm(target, axis=1, keepdims=True)
    target = target.at[2].set(0.0).at[5].set(0.0)   # invalid rows -> masked

    out_mean = loss_fn(pred, target, reduction="mean")
    out_sum = loss_fn(pred, target, reduction="sum")
    out_none = loss_fn(pred, target, reduction="none")
    jax.block_until_ready((out_mean, out_sum, out_none))

    assert jnp.allclose(out_mean, _reference(pred, target, "mean"),
                        rtol=1e-4, atol=1e-4)
    assert jnp.allclose(out_sum, _reference(pred, target, "sum"),
                        rtol=1e-4, atol=1e-4)
    assert out_none.shape == (B,)
    assert jnp.allclose(out_none, _reference(pred, target, "none"),
                        rtol=1e-4, atol=1e-4)

    # Larger ragged case: 2 shards x multiple grid steps x tail padding.
    B2 = 2500
    pred2 = jax.random.normal(k3, (B2, 3), dtype=jnp.float32)
    pred2 = pred2 / jnp.linalg.norm(pred2, axis=1, keepdims=True)
    target2 = jax.random.normal(k4, (B2, 3), dtype=jnp.float32)
    target2 = target2 / jnp.linalg.norm(target2, axis=1, keepdims=True)
    target2 = target2.at[7].set(0.0).at[1234].set(0.0).at[2499].set(0.0)

    out2_mean = loss_fn(pred2, target2, reduction="mean",
                        max_tile_n=128, num_shards=2)
    out2_sum = loss_fn(pred2, target2, reduction="sum",
                       max_tile_n=128, num_shards=2)
    out2_none = loss_fn(pred2, target2, reduction="none", max_tile_n=128)
    jax.block_until_ready((out2_mean, out2_sum, out2_none))

    assert jnp.allclose(out2_mean, _reference(pred2, target2, "mean"),
                        rtol=2e-4, atol=1e-4)
    assert jnp.allclose(out2_sum, _reference(pred2, target2, "sum"),
                        rtol=2e-4, atol=1e-2)
    assert jnp.allclose(out2_none, _reference(pred2, target2, "none"),
                        rtol=1e-4, atol=1e-4)

    print("KERNEL_OK")
</pallas_src>

<mosaic_0001>
module attributes {stable_mosaic.version = 11 : i64} {
  func.func @_angular_sum_kernel(%arg0: i32, %arg1: i32, %arg2: memref<3x8x128xf32, #tpu.memory_space<vmem>>, %arg3: memref<3x8x128xf32, #tpu.memory_space<vmem>>, %arg4: memref<1x8x128xf32, #tpu.memory_space<vmem>>, %arg5: memref<1x8x128xf32, #tpu.memory_space<vmem>>, %arg6: memref<8x128xf32, #tpu.memory_space<vmem>>, %arg7: memref<8x128xf32, #tpu.memory_space<vmem>>) attributes {dimension_semantics = [#tpu.dimension_semantics<parallel>, #tpu.dimension_semantics<arbitrary>], iteration_bounds = array<i64: 1, 1>, scalar_prefetch = 0 : i64, scratch_operands = 2 : i64, tpu.core_type = #tpu.core_type<tc>, window_params = [{transform_indices = @transform_0, window_bounds = array<i64: 3, 8, 128>}, {transform_indices = @transform_1, window_bounds = array<i64: 3, 8, 128>}, {transform_indices = @transform_2, window_bounds = array<i64: 1, 8, 128>}, {transform_indices = @transform_3, window_bounds = array<i64: 1, 8, 128>}]} {
    %c0_i32 = arith.constant 0 : i32
    %0 = arith.cmpi eq, %arg1, %c0_i32 : i32
    %1 = arith.extui %0 : i1 to i32
    %c0_i32_0 = arith.constant 0 : i32
    %2 = arith.cmpi ne, %1, %c0_i32_0 : i32
    scf.if %2 {
      %cst_39 = arith.constant 0.000000e+00 : f32
      %73 = vector.broadcast %cst_39 : f32 to vector<8x128xf32>
      %c0_40 = arith.constant 0 : index
      %c0_41 = arith.constant 0 : index
      %74 = vector.load %arg6[%c0_40, %c0_41] : memref<8x128xf32, #tpu.memory_space<vmem>>, vector<8x128xf32>
      tpu.vector_store %arg6[%c0_40, %c0_41], %73 {strides = array<i32>} : memref<8x128xf32, #tpu.memory_space<vmem>>, vector<8x128xf32>,
      %cst_42 = arith.constant 0.000000e+00 : f32
      %75 = vector.broadcast %cst_42 : f32 to vector<8x128xf32>
      %c0_43 = arith.constant 0 : index
      %c0_44 = arith.constant 0 : index
      %76 = vector.load %arg7[%c0_43, %c0_44] : memref<8x128xf32, #tpu.memory_space<vmem>>, vector<8x128xf32>
      tpu.vector_store %arg7[%c0_43, %c0_44], %75 {strides = array<i32>} : memref<8x128xf32, #tpu.memory_space<vmem>>, vector<8x128xf32>,
    } else {
    }
    %c0 = arith.constant 0 : index
    %c0_1 = arith.constant 0 : index
    %c0_2 = arith.constant 0 : index
    %3 = vector.load %arg2[%c0, %c0_1, %c0_2] : memref<3x8x128xf32, #tpu.memory_space<vmem>>, vector<3x8x128xf32>
    %c0_3 = arith.constant 0 : index
    %c0_4 = arith.constant 0 : index
    %c0_5 = arith.constant 0 : index
    %4 = vector.load %arg3[%c0_3, %c0_4, %c0_5] : memref<3x8x128xf32, #tpu.memory_space<vmem>>, vector<3x8x128xf32>
    %5 = arith.mulf %3, %4 : vector<3x8x128xf32>
    %cst = arith.constant dense<0.000000e+00> : vector<8x128xf32>
    %6 = vector.multi_reduction <add>, %5, %cst [0] : vector<3x8x128xf32> to vector<8x128xf32>
    %cst_6 = arith.constant -0.999899983 : f32
    %cst_7 = arith.constant 0.999899983 : f32
    %7 = vector.broadcast %cst_6 : f32 to vector<8x128xf32>
    %8 = arith.maximumf %7, %6 : vector<8x128xf32>
    %9 = vector.broadcast %cst_7 : f32 to vector<8x128xf32>
    %10 = arith.minimumf %9, %8 : vector<8x128xf32>
    %11 = math.absf %10 : vector<8x128xf32>
    %cst_8 = arith.constant 5.000000e-01 : f32
    %12 = vector.broadcast %cst_8 : f32 to vector<8x128xf32>
    %13 = arith.cmpf ogt, %11, %12 : vector<8x128xf32>
    %cst_9 = arith.constant 1.000000e+00 : f32
    %14 = vector.broadcast %cst_9 : f32 to vector<8x128xf32>
    %15 = arith.subf %14, %11 : vector<8x128xf32>
    %cst_10 = arith.constant 5.000000e-01 : f32
    %16 = vector.broadcast %cst_10 : f32 to vector<8x128xf32>
    %17 = arith.mulf %16, %15 : vector<8x128xf32>
    %18 = math.sqrt %17 : vector<8x128xf32>
    %19 = arith.select %13, %18, %11 : vector<8x128xi1>, vector<8x128xf32>
    %20 = arith.mulf %11, %11 : vector<8x128xf32>
    %21 = arith.select %13, %17, %20 : vector<8x128xi1>, vector<8x128xf32>
    %cst_11 = arith.constant 4.216320e-02 : f32
    %22 = vector.broadcast %cst_11 : f32 to vector<8x128xf32>
    %23 = arith.mulf %22, %21 : vector<8x128xf32>
    %cst_12 = arith.constant 0.024181312 : f32
    %24 = vector.broadcast %cst_12 : f32 to vector<8x128xf32>
    %25 = arith.addf %23, %24 : vector<8x128xf32>
    %26 = arith.mulf %25, %21 : vector<8x128xf32>
    %cst_13 = arith.constant 0.0454700254 : f32
    %27 = vector.broadcast %cst_13 : f32 to vector<8x128xf32>
    %28 = arith.addf %26, %27 : vector<8x128xf32>
    %29 = arith.mulf %28, %21 : vector<8x128xf32>
    %cst_14 = arith.constant 0.0749530047 : f32
    %30 = vector.broadcast %cst_14 : f32 to vector<8x128xf32>
    %31 = arith.addf %29, %30 : vector<8x128xf32>
    %32 = arith.mulf %31, %21 : vector<8x128xf32>
    %cst_15 = arith.constant 0.166667521 : f32
    %33 = vector.broadcast %cst_15 : f32 to vector<8x128xf32>
    %34 = arith.addf %32, %33 : vector<8x128xf32>
    %35 = arith.mulf %19, %21 : vector<8x128xf32>
    %36 = arith.mulf %35, %34 : vector<8x128xf32>
    %37 = arith.addf %19, %36 : vector<8x128xf32>
    %cst_16 = arith.constant 2.000000e+00 : f32
    %38 = vector.broadcast %cst_16 : f32 to vector<8x128xf32>
    %39 = arith.mulf %38, %37 : vector<8x128xf32>
    %cst_17 = arith.constant 1.57079637 : f32
    %40 = vector.broadcast %cst_17 : f32 to vector<8x128xf32>
    %41 = arith.subf %40, %37 : vector<8x128xf32>
    %42 = arith.select %13, %39, %41 : vector<8x128xi1>, vector<8x128xf32>
    %cst_18 = arith.constant 0.000000e+00 : f32
    %43 = vector.broadcast %cst_18 : f32 to vector<8x128xf32>
    %44 = arith.cmpf olt, %10, %43 : vector<8x128xf32>
    %cst_19 = arith.constant 3.14159274 : f32
    %45 = vector.broadcast %cst_19 : f32 to vector<8x128xf32>
    %46 = arith.subf %45, %42 : vector<8x128xf32>
    %47 = arith.select %44, %46, %42 : vector<8x128xi1>, vector<8x128xf32>
    %48 = arith.cmpf one, %47, %47 : vector<8x128xf32>
    %cst_20 = arith.constant 0.000000e+00 : f32
    %49 = vector.broadcast %cst_20 : f32 to vector<8x128xf32>
    %50 = arith.select %48, %49, %47 : vector<8x128xi1>, vector<8x128xf32>
    %cst_21 = arith.constant 0.000000e+00 : f32
    %51 = vector.broadcast %cst_21 : f32 to vector<3x8x128xf32>
    %52 = arith.cmpf one, %4, %51 : vector<3x8x128xf32>
    %cst_22 = arith.constant 1.000000e+00 : f32
    %cst_23 = arith.constant 0.000000e+00 : f32
    %53 = vector.broadcast %cst_22 : f32 to vector<3x8x128xf32>
    %54 = vector.broadcast %cst_23 : f32 to vector<3x8x128xf32>
    %55 = arith.select %52, %53, %54 : vector<3x8x128xi1>, vector<3x8x128xf32>
    %cst_24 = arith.constant dense<0xFF800000> : vector<8x128xf32>
    %56 = vector.multi_reduction <maximumf>, %55, %cst_24 [0] : vector<3x8x128xf32> to vector<8x128xf32>
    %cst_25 = arith.constant 0.000000e+00 : f32
    %57 = vector.broadcast %cst_25 : f32 to vector<8x128xf32>
    %58 = arith.cmpf ogt, %56, %57 : vector<8x128xf32>
    %c0_26 = arith.constant 0 : index
    %c0_27 = arith.constant 0 : index
    %59 = vector.load %arg6[%c0_26, %c0_27] : memref<8x128xf32, #tpu.memory_space<vmem>>, vector<8x128xf32>
    %cst_28 = arith.constant 0.000000e+00 : f32
    %60 = vector.broadcast %cst_28 : f32 to vector<8x128xf32>
    %61 = arith.select %58, %50, %60 : vector<8x128xi1>, vector<8x128xf32>
    %62 = arith.addf %59, %61 : vector<8x128xf32>
    %c0_29 = arith.constant 0 : index
    %c0_30 = arith.constant 0 : index
    %63 = vector.load %arg6[%c0_29, %c0_30] : memref<8x128xf32, #tpu.memory_space<vmem>>, vector<8x128xf32>
    tpu.vector_store %arg6[%c0_29, %c0_30], %62 {strides = array<i32>} : memref<8x128xf32, #tpu.memory_space<vmem>>, vector<8x128xf32>,
    %c0_31 = arith.constant 0 : index
    %c0_32 = arith.constant 0 : index
    %64 = vector.load %arg7[%c0_31, %c0_32] : memref<8x128xf32, #tpu.memory_space<vmem>>, vector<8x128xf32>
    %cst_33 = arith.constant 1.000000e+00 : f32
    %cst_34 = arith.constant 0.000000e+00 : f32
    %65 = vector.broadcast %cst_33 : f32 to vector<8x128xf32>
    %66 = vector.broadcast %cst_34 : f32 to vector<8x128xf32>
    %67 = arith.select %58, %65, %66 : vector<8x128xi1>, vector<8x128xf32>
    %68 = arith.addf %64, %67 : vector<8x128xf32>
    %c0_35 = arith.constant 0 : index
    %c0_36 = arith.constant 0 : index
    %69 = vector.load %arg7[%c0_35, %c0_36] : memref<8x128xf32, #tpu.memory_space<vmem>>, vector<8x128xf32>
    tpu.vector_store %arg7[%c0_35, %c0_36], %68 {strides = array<i32>} : memref<8x128xf32, #tpu.memory_space<vmem>>, vector<8x128xf32>,
    %c0_i32_37 = arith.constant 0 : i32
    %70 = arith.cmpi eq, %arg1, %c0_i32_37 : i32
    %71 = arith.extui %70 : i1 to i32
    %c0_i32_38 = arith.constant 0 : i32
    %72 = arith.cmpi ne, %71, %c0_i32_38 : i32
    scf.if %72 {
      %c0_39 = arith.constant 0 : index
      %c0_40 = arith.constant 0 : index
      %73 = vector.load %arg6[%c0_39, %c0_40] : memref<8x128xf32, #tpu.memory_space<vmem>>, vector<8x128xf32>
      %74 = vector.shape_cast %73 : vector<8x128xf32> to vector<1x8x128xf32>
      %cst_41 = arith.constant dense<0.000000e+00> : vector<1xf32>
      %75 = vector.multi_reduction <add>, %74, %cst_41 [1, 2] : vector<1x8x128xf32> to vector<1xf32>
      %76 = vector.shape_cast %75 : vector<1xf32> to vector<1x1x1xf32>
      %77 = vector.extract %76[0, 0, 0] : f32 from vector<1x1x1xf32>
      %78 = vector.broadcast %77 : f32 to vector<1x8x128xf32>
      %c0_42 = arith.constant 0 : index
      %c0_43 = arith.constant 0 : index
      %c0_44 = arith.constant 0 : index
      %79 = vector.load %arg4[%c0_42, %c0_43, %c0_44] : memref<1x8x128xf32, #tpu.memory_space<vmem>>, vector<1x8x128xf32>
      tpu.vector_store %arg4[%c0_42, %c0_43, %c0_44], %78 {strides = array<i32>} : memref<1x8x128xf32, #tpu.memory_space<vmem>>, vector<1x8x128xf32>,
      %c0_45 = arith.constant 0 : index
      %c0_46 = arith.constant 0 : index
      %80 = vector.load %arg7[%c0_45, %c0_46] : memref<8x128xf32, #tpu.memory_space<vmem>>, vector<8x128xf32>
      %81 = vector.shape_cast %80 : vector<8x128xf32> to vector<1x8x128xf32>
      %cst_47 = arith.constant dense<0.000000e+00> : vector<1xf32>
      %82 = vector.multi_reduction <add>, %81, %cst_47 [1, 2] : vector<1x8x128xf32> to vector<1xf32>
      %83 = vector.shape_cast %82 : vector<1xf32> to vector<1x1x1xf32>
      %84 = vector.extract %83[0, 0, 0] : f32 from vector<1x1x1xf32>
      %85 = vector.broadcast %84 : f32 to vector<1x8x128xf32>
      %c0_48 = arith.constant 0 : index
      %c0_49 = arith.constant 0 : index
      %c0_50 = arith.constant 0 : index
      %86 = vector.load %arg5[%c0_48, %c0_49, %c0_50] : memref<1x8x128xf32, #tpu.memory_space<vmem>>, vector<1x8x128xf32>
      tpu.vector_store %arg5[%c0_48, %c0_49, %c0_50], %85 {strides = array<i32>} : memref<1x8x128xf32, #tpu.memory_space<vmem>>, vector<1x8x128xf32>,
    } else {
    }
    return
  }
  func.func @transform_0(%arg0: i32, %arg1: i32) -> (i32, i32, i32) {
    %c1_i32 = arith.constant 1 : i32
    %0 = arith.muli %arg0, %c1_i32 : i32
    %1 = arith.addi %0, %arg1 : i32
    %c0_i32 = arith.constant 0 : i32
    %c0_i32_0 = arith.constant 0 : i32
    %c0_i32_1 = arith.constant 0 : i32
    return %c0_i32, %c0_i32_0, %1 : i32, i32, i32
  }
  func.func @transform_1(%arg0: i32, %arg1: i32) -> (i32, i32, i32) {
    %c1_i32 = arith.constant 1 : i32
    %0 = arith.muli %arg0, %c1_i32 : i32
    %1 = arith.addi %0, %arg1 : i32
    %c0_i32 = arith.constant 0 : i32
    %c0_i32_0 = arith.constant 0 : i32
    %c0_i32_1 = arith.constant 0 : i32
    return %c0_i32, %c0_i32_0, %1 : i32, i32, i32
  }
  func.func @transform_2(%arg0: i32, %arg1: i32) -> (i32, i32, i32) {
    %c0_i32 = arith.constant 0 : i32
    %c0_i32_0 = arith.constant 0 : i32
    %c0_i32_1 = arith.constant 0 : i32
    return %arg0, %c0_i32, %c0_i32_0 : i32, i32, i32
  }
  func.func @transform_3(%arg0: i32, %arg1: i32) -> (i32, i32, i32) {
    %c0_i32 = arith.constant 0 : i32
    %c0_i32_0 = arith.constant 0 : i32
    %c0_i32_1 = arith.constant 0 : i32
    return %arg0, %c0_i32, %c0_i32_0 : i32, i32, i32
  }
}

</mosaic_0001>

<bundles_post_ra>
// kernel: spherical_angular_loss.1
= control target key start
LH: loop header
LB: loop body
LE: loop exit
PB: predicated region body
PF: predicated region fallthrough
CT: control target
= control target key end

     0   :  { %v176_v37 = vmov 0.0   ;;  %s224_s0 = inlined_call_operand.vmem [shape: f32[3,8,128], index: 0, kind: input, shape index: {}]   ;;  %s225_s1 = inlined_call_operand.vmem [shape: f32[3,8,128], index: 1, kind: input, shape index: {}]   ;;  %s226_s2 = inlined_call_operand.vmem [shape: f32[1,8,128], index: 2, kind: output, shape index: {0}]   ;;  %s227_s3 = inlined_call_operand.vmem [shape: f32[1,8,128], index: 3, kind: output, shape index: {1}]  }
   0x1   :  { %v53_v0 = vld [vmem:[%s224_s0] sm:$0xff]  ;;  %v54_v1 = vld [vmem:[%s224_s0 + $0x8] sm:$0xff]  ;;  %v55_v2 = vld [vmem:[%s224_s0 + $0x10] sm:$0xff] }
   0x2   :  { %v56_v3 = vld [vmem:[%s225_s1] sm:$0xff]  ;;  %v57_v4 = vld [vmem:[%s225_s1 + $0x8] sm:$0xff]  ;;  %v58_v5 = vld [vmem:[%s225_s1 + $0x10] sm:$0xff] }
   0x3   :  { %v59_v6 = vmul.f32 %v56_v3, %v53_v0  ;;  %v60_v7 = vmul.f32 %v57_v4, %v54_v1  ;;  %v61_v8 = vmul.f32 %v58_v5, %v55_v2  ;;  %vm104_vm3 = vcmp.ne.f32.partialorder %v56_v3, 0.0 }
   0x4   :  { %vm105_vm4 = vcmp.ne.f32.partialorder %v57_v4, 0.0  ;;  %v107_v38 = vsel %vm104_vm3, 1.0, %v176_v37  ;;  %vm106_vm5 = vcmp.ne.f32.partialorder %v58_v5, 0.0 }
   0x5   :  { %v62_v9 = vadd.f32 %v60_v7, %v59_v6  ;;  %v108_v39 = vsel %vm105_vm4, 1.0, %v176_v37  ;;  %v109_v43 = vsel %vm106_vm5, 1.0, %v176_v37 }
   0x6   :  { %v110_v41 = vmax.f32 %v107_v38, %v108_v39 }
   0x7   :  { %v63_v10 = vadd.f32 %v62_v9, %v61_v8 }
   0x8   :  { %v111_v46 = vmax.f32 %v110_v41, %v109_v43 }
   0x9   :  { %v168_v11 = vclamps-f32 %v63_v10, 0.9999 }
   0xa   :  { %vm112_vm7 = vcmp.gt.f32.partialorder %v111_v46, 0.0 }
   0xb   :  { %v66_v12 = vand.u32 2147483647, %v168_v11  ;;  %vm99_vm6 = vcmp.lt.f32.partialorder %v168_v11, 0.0  ;;  %v118_v52 = vsel %vm112_vm7, 1.0, %v176_v37 }
   0xd   :  { %v68_v13 = vsub.f32 1.0, %v66_v12  ;;  %v83_v14 = vmul.f32 %v66_v12, %v66_v12  ;;  %vm67_vm0 = vcmp.gt.f32.partialorder %v66_v12, 0.5 }
   0xf   :  { %v69_v15 = vmul.f32 0.5, %v68_v13 }
  0x11   :  { %174 = vrsqrt.f32 %v69_v15  ;;  %v84_v16 = vsel %vm67_vm0, %v69_v15, %v83_v14  ;;  %vm77_vm1 = vcmp.eq.f32.partialorder %v69_v15, inf  ;;  %v80_v29 = vand.u32 2147483648, %v69_v15 }
  0x12   :  { %v85_v17 = vmul.f32 0.0421632, %v84_v16  ;;  %vm79_vm2 = vcmp.eq.f32.partialorder %v69_v15, 0.0 }
  0x14   :  { %v86_v18 = vadd.f32 0.024181312, %v85_v17 }
  0x16   :  { %v87_v20 = vmul.f32 %v86_v18, %v84_v16 }
  0x17   :  { %v175_v19 = vpop.eup %174 }
  0x18   :  { %v71_v21 = vmul.f32 %v175_v19, %v69_v15  ;;  %v88_v22 = vadd.f32 0.045470025, %v87_v20 }
  0x1a   :  { %v72_v23 = vmul.f32 %v175_v19, %v71_v21  ;;  %v89_v24 = vmul.f32 %v88_v22, %v84_v16 }
  0x1c   :  { %v73_v25 = vmul.f32 0.5, %v72_v23  ;;  %v90_v26 = vadd.f32 0.074953005, %v89_v24 }
  0x1e   :  { %v74_v27 = vsub.f32 1.5, %v73_v25  ;;  %v91_v30 = vmul.f32 %v90_v26, %v84_v16 }
  0x20   :  { %v75_v28 = vmul.f32 %v175_v19, %v74_v27  ;;  %v92_v34 = vadd.f32 0.16666752, %v91_v30 }
  0x22   :  { %v76_v31 = vmul.f32 %v75_v28, %v69_v15 }
  0x24   :  { %v78_v32 = vsel %vm77_vm1, %v69_v15, %v76_v31 }
  0x25   :  { %v81_v33 = vsel %vm79_vm2, %v80_v29, %v78_v32 }
  0x26   :  { %v82_v35 = vsel %vm67_vm0, %v81_v33, %v66_v12 }
  0x27   :  { %v93_v36 = vmul.f32 %v84_v16, %v82_v35 }
  0x29   :  { %v94_v40 = vmul.f32 %v93_v36, %v92_v34 }
  0x2b   :  { %v95_v42 = vadd.f32 %v94_v40, %v82_v35 }
  0x2d   :  { %v96_v44 = vmul.f32 2.0, %v95_v42  ;;  %v97_v45 = vsub.f32 1.5707964, %v95_v42 }
  0x2f   :  { %v98_v47 = vsel %vm67_vm0, %v96_v44, %v97_v45 }
  0x30   :  { %v100_v48 = vsub.f32 3.1415927, %v98_v47 }
  0x32   :  { %v101_v49 = vsel %vm99_vm6, %v100_v48, %v98_v47 }
  0x33   :  { %vm102_vm8 = vcmp.ne.f32.partialorder %v101_v49, %v101_v49 }
  0x34   :  { %v103_v50 = vsel %vm102_vm8, 0.0, %v101_v49 }
  0x35   :  { %v114_v51 = vsel %vm112_vm7, %v103_v50, 0.0 }
  0x36   :  { %125 = vadd.xlane.f32.xlu0 %v114_v51 }
  0x3e   :  { %137 = vadd.xlane.f32.xlu0 %v118_v52 }
  0xa9   :  { %v126_v53 = vpop.xlane.xlu0 %125 }
  0xaa   :  { %v127_v54 = vrot.slane %v126_v53, 4 }
  0xac   :  { %v128_v55 = vadd.f32 %v127_v54, %v126_v53 }
  0xae   :  { %v129_v56 = vrot.slane %v128_v55, 2 }
  0xb0   :  { %v130_v57 = vadd.f32 %v129_v56, %v128_v55 }
  0xb1   :  { %v138_v58 = vpop.xlane.xlu0 %137 }
  0xb2   :  { %v139_v59 = vrot.slane %v138_v58, 4  ;;  %v131_v60 = vrot.slane %v130_v57, 1 }
  0xb4   :  { %v140_v61 = vadd.f32 %v139_v59, %v138_v58  ;;  %v132_v62 = vadd.f32 %v131_v60, %v130_v57 }
  0xb6   :  { %v141_v63 = vrot.slane %v140_v61, 2  ;;  %169 = vpush %v132_v62 }
  0xb8   :  { %v142_v0 = vadd.f32 %v141_v63, %v140_v61 }
  0xba   :  { %v143_v1 = vrot.slane %v142_v0, 1 }
  0xbc   :  { %v144_v2 = vadd.f32 %v143_v1, %v142_v0 }
  0xbe   :  { %171 = vpush %v144_v2 }
  0xe7   :  { %s170_s0 = spop %169 }
  0xe8   :  { %v134_v3 = vstv %s170_s0 }
  0xe9   :  { %135 = vst [vmem:[%s226_s2] sm:$0xff] %v134_v3 }
  0xef   :  { %s172_s25 = spop %171 }
  0xf0   :  { %v146_v4 = vstv %s172_s25 }
  0xf1   :  { %147 = vst [vmem:[%s227_s3] sm:$0xff] %v146_v4 }

</bundles_post_ra>
